<compile_context>
chip_gen: v7x
topology: tpu7x:2x2x1
jax: 0.10.0
libtpu: 0.0.40
codegen_flags: <defaults>
</compile_context>

<pallas_src>
import functools

import jax
import jax.numpy as jnp
from jax.experimental import pallas as pl
from jax.experimental.pallas import tpu as pltpu


# ---------------------------------------------------------------------------
# Pallas kernel: out = act(x @ w + b)
# ---------------------------------------------------------------------------
def _matmul_bias_act_kernel(x_ref, w_ref, b_ref, o_ref, *, apply_sigmoid):
    acc = jnp.dot(x_ref[...], w_ref[...], preferred_element_type=jnp.float32)
    y = acc + b_ref[...]
    if apply_sigmoid:  # static flag -> specialized kernel, EUP exp
        y = 1.0 / (1.0 + jnp.exp(-y))
    o_ref[...] = y.astype(o_ref.dtype)


# ---------------------------------------------------------------------------
# pallas_call wrapper
# ---------------------------------------------------------------------------
def _round_up(x, n):
    return ((x + n - 1) // n) * n


def _row_tiling(m, target=512):
    """Pick (row_tile, padded_rows): row_tile % 8 == 0 (or full), >=2 grid
    steps for large m so the parallel grid can pipeline / use both v7x TCs."""
    if m <= target:
        return m, m
    # Prefer an exact divisor of m that is a multiple of 8 and <= target.
    for g in range(2, 65):
        if m % g == 0 and (m // g) % 8 == 0 and (m // g) <= target:
            return m // g, m
    # Fallback: fixed tile with zero-padded remainder rows.
    return target, _round_up(m, target)


def matmul_bias_act(x, w, b, *, sigmoid):
    """x:(m,k) @ w:(k,co) + b:(co,), optional sigmoid, via Pallas on TPU."""
    m, k = x.shape
    k2, co = w.shape
    assert k == k2, (k, k2)

    co_p = max(128, _round_up(co, 128))          # lane-dense output stores
    tm, m_p = _row_tiling(m)

    xp = x if m_p == m else jnp.pad(x, ((0, m_p - m), (0, 0)))
    wp = w if co_p == co else jnp.pad(w, ((0, 0), (0, co_p - co)))
    bp = jnp.pad(b.reshape(1, co), ((0, 0), (0, co_p - co)))

    grid = (m_p // tm,)
    kernel = functools.partial(_matmul_bias_act_kernel, apply_sigmoid=sigmoid)

    out = pl.pallas_call(
        kernel,
        out_shape=jax.ShapeDtypeStruct((m_p, co_p), jnp.float32),
        grid_spec=pltpu.PrefetchScalarGridSpec(
            num_scalar_prefetch=0,
            grid=grid,
            in_specs=[
                pl.BlockSpec((tm, k), lambda i: (i, 0)),      # activations
                pl.BlockSpec((k, co_p), lambda i: (0, 0)),    # packed weights
                pl.BlockSpec((1, co_p), lambda i: (0, 0)),    # bias
            ],
            out_specs=pl.BlockSpec((tm, co_p), lambda i: (i, 0)),
        ),
        compiler_params=pltpu.CompilerParams(
            dimension_semantics=("parallel",)),
    )(xp, wp, bp)

    return out[:m, :co]


# ---------------------------------------------------------------------------
# Host-side glue: packed-K im2col, weight packing, 2x2 average pooling
# ---------------------------------------------------------------------------
def _im2col(x_nhwc, ksize, padding):
    """Return (n*ho*wo, ksize*ksize*ci) with column order (dy, dx, ci)."""
    n, h, w, c = x_nhwc.shape
    ho = h + 2 * padding - ksize + 1
    wo = w + 2 * padding - ksize + 1
    xp = jnp.pad(x_nhwc, ((0, 0), (padding, padding), (padding, padding), (0, 0)))
    cols = []
    for dy in range(ksize):
        for dx in range(ksize):
            cols.append(xp[:, dy:dy + ho, dx:dx + wo, :].reshape(n * ho * wo, c))
    return jnp.concatenate(cols, axis=1), (ho, wo)


def _pack_conv_weight(w_oihw):
    """OIHW -> (kh*kw*ci, co) matching the _im2col column order."""
    co, ci, kh, kw = w_oihw.shape
    return jnp.transpose(w_oihw, (2, 3, 1, 0)).reshape(kh * kw * ci, co)


def _avgpool2x2_nhwc(x):
    n, h, w, c = x.shape
    return x.reshape(n, h // 2, 2, w // 2, 2, c).mean(axis=(2, 4))


# ---------------------------------------------------------------------------
# LeNet forward (matches the PyTorch module, input NCHW, in_c x 28 x 28)
# ---------------------------------------------------------------------------
def lenet_forward(x_nchw, p):
    n = x_nchw.shape[0]
    x = jnp.transpose(x_nchw, (0, 2, 3, 1))                      # NHWC

    # conv1 (5x5, pad=2) + sigmoid, then 2x2 avg pool
    cols, (ho, wo) = _im2col(x, 5, 2)
    y = matmul_bias_act(cols, _pack_conv_weight(p["w1"]), p["b1"], sigmoid=True)
    y = _avgpool2x2_nhwc(y.reshape(n, ho, wo, p["w1"].shape[0]))  # (n,14,14,6)

    # conv2 (5x5, pad=0) + sigmoid, then 2x2 avg pool
    cols, (ho, wo) = _im2col(y, 5, 0)
    y = matmul_bias_act(cols, _pack_conv_weight(p["w2"]), p["b2"], sigmoid=True)
    y = _avgpool2x2_nhwc(y.reshape(n, ho, wo, p["w2"].shape[0]))  # (n,5,5,16)

    # flatten in PyTorch NCHW order
    y = jnp.transpose(y, (0, 3, 1, 2)).reshape(n, -1)             # (n, 400)

    # fully-connected stack
    y = matmul_bias_act(y, p["wf1"].T, p["bf1"], sigmoid=True)    # (n, 120)
    y = matmul_bias_act(y, p["wf2"].T, p["bf2"], sigmoid=True)    # (n, 84)
    y = matmul_bias_act(y, p["wf3"].T, p["bf3"], sigmoid=False)   # (n, classes)
    return y


# ---------------------------------------------------------------------------
# Pure-JAX reference (correctness check)
# ---------------------------------------------------------------------------
def _reference(x, p):
    def conv(xx, ww, bb, pad):
        y = jax.lax.conv_general_dilated(
            xx, ww, (1, 1), [(pad, pad), (pad, pad)],
            dimension_numbers=("NCHW", "OIHW", "NCHW"))
        return y + bb[None, :, None, None]

    def sig(z):
        return 1.0 / (1.0 + jnp.exp(-z))

    def pool(z):
        n, c, h, w = z.shape
        return z.reshape(n, c, h // 2, 2, w // 2, 2).mean(axis=(3, 5))

    y = pool(sig(conv(x, p["w1"], p["b1"], 2)))
    y = pool(sig(conv(y, p["w2"], p["b2"], 0)))
    y = y.reshape(y.shape[0], -1)
    y = sig(y @ p["wf1"].T + p["bf1"])
    y = sig(y @ p["wf2"].T + p["bf2"])
    return y @ p["wf3"].T + p["bf3"]


# ---------------------------------------------------------------------------
if __name__ == "__main__":
    N, IN_C, NUM_CLASSES = 2, 1, 10

    keys = jax.random.split(jax.random.PRNGKey(0), 12)

    def xavier(k, shape, fan_in, fan_out):
        a = (6.0 / (fan_in + fan_out)) ** 0.5
        return jax.random.uniform(k, shape, jnp.float32, -a, a)

    def small(k, shape, scale=0.05):
        return scale * jax.random.normal(k, shape, jnp.float32)

    params = dict(
        w1=xavier(keys[0], (6, IN_C, 5, 5), IN_C * 25, 6 * 25),
        b1=small(keys[1], (6,)),
        w2=xavier(keys[2], (16, 6, 5, 5), 6 * 25, 16 * 25),
        b2=small(keys[3], (16,)),
        wf1=xavier(keys[4], (120, 16 * 5 * 5), 400, 120),   # PyTorch (out,in)
        bf1=small(keys[5], (120,)),
        wf2=xavier(keys[6], (84, 120), 120, 84),
        bf2=small(keys[7], (84,)),
        wf3=xavier(keys[8], (NUM_CLASSES, 84), 84, NUM_CLASSES),
        bf3=small(keys[9], (NUM_CLASSES,)),
    )
    x = jax.random.normal(keys[10], (N, IN_C, 28, 28), jnp.float32)

    out = lenet_forward(x, params)
    out = jax.block_until_ready(out)

    ref = _reference(x, params)
    assert out.shape == ref.shape == (N, NUM_CLASSES), (out.shape, ref.shape)
    max_diff = float(jnp.max(jnp.abs(out - ref)))
    assert jnp.allclose(out, ref, atol=2e-4, rtol=2e-4), f"max abs diff {max_diff}"

    print("KERNEL_OK")
</pallas_src>

<mosaic_0001>
module attributes {stable_mosaic.version = 11 : i64} {
  func.func @_matmul_bias_act_kernel(%arg0: i32, %arg1: memref<392x25xf32, #tpu.memory_space<vmem>>, %arg2: memref<25x128xf32, #tpu.memory_space<vmem>>, %arg3: memref<1x128xf32, #tpu.memory_space<vmem>>, %arg4: memref<392x128xf32, #tpu.memory_space<vmem>>) attributes {dimension_semantics = [#tpu.dimension_semantics<parallel>], iteration_bounds = array<i64: 4>, scalar_prefetch = 0 : i64, scratch_operands = 0 : i64, tpu.core_type = #tpu.core_type<tc>, window_params = [{transform_indices = @transform_0, window_bounds = array<i64: 392, 25>}, {pipeline_mode = #tpu.pipeline_mode<synchronous>, transform_indices = @transform_1, window_bounds = array<i64: 25, 128>}, {pipeline_mode = #tpu.pipeline_mode<synchronous>, transform_indices = @transform_2, window_bounds = array<i64: 1, 128>}, {transform_indices = @transform_3, window_bounds = array<i64: 392, 128>}]} {
    %c0 = arith.constant 0 : index
    %c0_0 = arith.constant 0 : index
    %0 = vector.load %arg1[%c0, %c0_0] : memref<392x25xf32, #tpu.memory_space<vmem>>, vector<392x25xf32>
    %c0_1 = arith.constant 0 : index
    %c0_2 = arith.constant 0 : index
    %1 = vector.load %arg2[%c0_1, %c0_2] : memref<25x128xf32, #tpu.memory_space<vmem>>, vector<25x128xf32>
    %cst = arith.constant dense<0.000000e+00> : vector<392x128xf32>
    %2 = tpu.matmul %0, %1, %cst {dimension_numbers = #tpu.dot_dimension_numbers<[1], [0], [0], [1], [0, 0, 1, 1], [], []>} : vector<392x25xf32>, vector<25x128xf32>, vector<392x128xf32> -> vector<392x128xf32>
    %c0_3 = arith.constant 0 : index
    %c0_4 = arith.constant 0 : index
    %3 = vector.load %arg3[%c0_3, %c0_4] : memref<1x128xf32, #tpu.memory_space<vmem>>, vector<1x128xf32>
    %4 = vector.broadcast %3 : vector<1x128xf32> to vector<392x128xf32>
    %5 = arith.addf %2, %4 : vector<392x128xf32>
    %cst_5 = arith.constant 0.000000e+00 : f32
    %6 = vector.broadcast %cst_5 : f32 to vector<392x128xf32>
    %7 = arith.subf %6, %5 : vector<392x128xf32>
    %8 = math.exp %7 : vector<392x128xf32>
    %cst_6 = arith.constant 1.000000e+00 : f32
    %9 = vector.broadcast %cst_6 : f32 to vector<392x128xf32>
    %10 = arith.addf %9, %8 : vector<392x128xf32>
    %cst_7 = arith.constant 1.000000e+00 : f32
    %11 = vector.broadcast %cst_7 : f32 to vector<392x128xf32>
    %12 = arith.divf %11, %10 : vector<392x128xf32>
    %c0_8 = arith.constant 0 : index
    %c0_9 = arith.constant 0 : index
    %13 = vector.load %arg4[%c0_8, %c0_9] : memref<392x128xf32, #tpu.memory_space<vmem>>, vector<392x128xf32>
    tpu.vector_store %arg4[%c0_8, %c0_9], %12 {strides = array<i32>} : memref<392x128xf32, #tpu.memory_space<vmem>>, vector<392x128xf32>,
    return
  }
  func.func @transform_0(%arg0: i32) -> (i32, i32) {
    %c0_i32 = arith.constant 0 : i32
    %c0_i32_0 = arith.constant 0 : i32
    return %arg0, %c0_i32 : i32, i32
  }
  func.func @transform_1(%arg0: i32) -> (i32, i32) {
    %c0_i32 = arith.constant 0 : i32
    %c0_i32_0 = arith.constant 0 : i32
    %c0_i32_1 = arith.constant 0 : i32
    return %c0_i32, %c0_i32_0 : i32, i32
  }
  func.func @transform_2(%arg0: i32) -> (i32, i32) {
    %c0_i32 = arith.constant 0 : i32
    %c0_i32_0 = arith.constant 0 : i32
    %c0_i32_1 = arith.constant 0 : i32
    return %c0_i32, %c0_i32_0 : i32, i32
  }
  func.func @transform_3(%arg0: i32) -> (i32, i32) {
    %c0_i32 = arith.constant 0 : i32
    %c0_i32_0 = arith.constant 0 : i32
    return %arg0, %c0_i32 : i32, i32
  }
}

</mosaic_0001>

<bundles_post_ra>
// kernel: tpu_custom_call.1
= control target key start
LH: loop header
LB: loop body
LE: loop exit
PB: predicated region body
PF: predicated region fallthrough
CT: control target
= control target key end

     0   :  { %8 = vsyncpa [#allocation3], 0  ;;  %s2151_s0 = inlined_call_operand.vmem [shape: f32[1568,25], index: 0, kind: input, shape index: {}]   ;;  %s2152_s1 = inlined_call_operand.vmem [shape: f32[25,128], index: 1, kind: input, shape index: {}]   ;;  %s2153_s2 = inlined_call_operand.vmem [shape: f32[1,128], index: 2, kind: input, shape index: {}]   ;;  %s2154_s3 = inlined_call_operand.hbm [shape: f32[1568,128], index: 3, kind: output, shape index: {}]  }
   0x1   :  { %10 = vsyncpa [#allocation3 + $0x1], 0  ;;  %s1725_s12 = smov 0   ;;  %s1727_s13 = smov 0  }
   0x2   :  { %s1729_s14 = smov 0   ;;  %s1731_s15 = smov 0  }
   0x3 LB: > { %s1746_s16 = sadd.s32 4294967295, %s1696_s15   ;;  %s1113_s17 = sadd.s32 4294967294, %s1696_s15   ;;  %s1696_s15 = sphi %s1731_s15, %s2160_s15   ;;  %s1692_s14 = sphi %s1729_s14, %s2159_s14   ;;  %s1688_s13 = sphi %s1727_s13, %s2158_s13   ;;  %s1684_s12 = sphi %s1725_s12, %s2157_s12  }
   0x4   : > { %s1750_s18 = sadd.s32 1, %s1696_s15   ;;  %s91_s19 = sadd.s32 1, %s1692_s14 }
   0x5   : > { %s88_s20 = ssub.s32 %s1696_s15, %s1750_s18  ;;  %p101_p0 = scmp.ne.s32.totalorder %s1692_s14, %s1688_s13 }
   0x6   : > { %p89_p1 = scmp.eq.s32.totalorder %s88_s20, 0  ;;  %p102_p2 = scmp.eq.s32.totalorder %s1746_s16, 3 }
   0x7   : > { %p107_p3 = scmp.ne.s32.totalorder %s1688_s13, %s1684_s12  ;;  %p108_p4 = scmp.eq.s32.totalorder %s1113_s17, 3 }
   0x8   : > { %s1761_s21 = scalar_select %p89_p1, %s1692_s14, %s91_s19  }
   0x9   : > { %p1763_p5 = por %p102_p2, %p101_p0  ;;  %p1767_p6 = por %p108_p4, %p107_p3 }
   0xa   : > { %p1116_p7 = scmp.ge.s32.totalorder %s1696_s15, 1  ;;  %p141_p8 = scmp.lt.s32.totalorder %s1696_s15, 5 }
   0xc   : > { %p142_p9 = pnand %p1116_p7, %p141_p8 }
   0xd   : > { %v221_v0 = vld [vmem:[%s2152_s1] sm:$0xff] (!%p142_p9)  ;;  %v222_v1 = vld [vmem:[%s2152_s1 + $0x8] sm:$0xff] (!%p142_p9)  ;;  %v223_v2 = vld [vmem:[%s2152_s1 + $0x10] sm:$0xff] (!%p142_p9)  ;;  %vm380_vm0 = vcmask (!%p142_p9), 1040384   ;;  %v1698_v3 = vmov (!%p142_p9), 0.0|0.0   ;;  %s165_s5 = smul.u32 (!%p142_p9), 49, %s1746_s16 }
   0xe   : > { %145 = sbr.rel (%p142_p9) target bundleno = 380 (0x17c), region = 32  ;;  %1381 = vmatprep.subr.bf16.mxu0 (!%p142_p9), %v1698_v3  ;;  %v1382_v4 = vpack.c.bf16 (!%p142_p9), %v222_v1, %v221_v0  ;;  %1388 = vmatprep.subr.bf16.mxu1 (!%p142_p9), %v1698_v3  ;;  %v224_v5 = vld [vmem:[%s2152_s1 + $0x18] sm:$0x1] (!%p142_p9)  ;;  %vm1699_vm1 = vmmov (!%p142_p9), 0   ;;  %v1700_v6 = vmov (!%p142_p9), 0.0   ;;  %vm1701_vm2 = vmmov (!%p142_p9), 1  }
   0xf   : > { %1234 = vmatprep.mubr.msk.f32.mxu0 (!%p142_p9), %vm1699_vm1, %v1700_v6  ;;  %1309 = vmatprep.mubr.msk.f32.mxu1 (!%p142_p9), %vm1699_vm1, %v1700_v6  ;;  %v1385_v7 = vpack.c.bf16 (!%p142_p9), %v224_v5, %v223_v2  ;;  %p166_p10 = scmp.lt.s32.totalorder (!%p142_p9), %s165_s5, 195  ;;  %vm1386_vm3 = vmpackc.low (!%p142_p9), %vm380_vm0, %vm1701_vm2  ;;  %vm232_vm4 = vcmask (!%p142_p9), 203776   ;;  %v1991_v57 = vld [vmem:[%s2153_s2] ss:$0 sm:$0xff] (!%p142_p9)  ;;  %s162_s17 = sand.u32 (!%p142_p9), 1, %s1688_s13  }
  0x10   : > { %1383 = vmatpush3.bf16.msra.mxu0 (!%p142_p9), %v1382_v4  ;;  %1390 = vmatpush3.bf16.msra.mxu1 (!%p142_p9), %v1382_v4  ;;  %s2008_s19 = smul.u32 (!%p142_p9), 392, %s162_s17  ;;  %s1702_s30 = smov (!%p142_p9), [#allocation2]  }
  0x11   : > { %1384 = vmatprep.subr.bf16.mxu0 (!%p142_p9), %v1698_v3  ;;  %1389 = vmatprep.subr.bf16.mxu1 (!%p142_p9), %v1698_v3  ;;  %s1172_s24 = smul.u32 (!%p142_p9), 6272, %s1746_s16  ;;  %s2110_s16 = scalar_lea.sflag (!%p142_p9), [#allocation3], %s162_s17 }
  0x12   : > { %s2015_s20 = scalar_lea.vmem (!%p142_p9), [#allocation2], %s2008_s19  ;;  %s1638_s4 = sshll.u32 (!%p142_p9), %s1702_s30, 4  ;;  %s1639_s4 = int_to_ptr.vmem [resolvable:$false] %s1638_s4 }
  0x13   : > { %s1051_s25 = sshll.u32 (!%p142_p9), %s2015_s20, 4  ;;  %s2103_s28 = scalar_lea.hbm (!%p142_p9), %s2154_s3, %s1172_s24  ;;  %s2105_s25 = int_to_ptr.vmem [resolvable:$true] %s1051_s25 }
  0x14   : > { %1387 = vmatpush3.bf16.msk.msra.mxu0 (!%p142_p9), %vm1386_vm3, %v1385_v7  ;;  %1391 = vmatpush3.bf16.msk.msra.mxu1 (!%p142_p9), %vm1386_vm3, %v1385_v7  ;;  %s1634_s29 = scalar_lea.vmem (!%p142_p9), %s2105_s25, 6272  ;;  %p1641_p0 = scmp.lt.s32.totalorder (!%p142_p9), %s2105_s25, %s1639_s4 }
  0x15   : > { %s2162_s5 = smov (!%p166_p10, %s165_s5), 195  ;;  %p1635_p11 = scmp.ne.s32.totalorder %s2105_s25, %s1634_s29 }
  0x16   : > { %s1117_s6 = sshll.u32 %s2162_s5, 3  ;;  %s1640_s5 = scalar_lea.vmem %s1639_s4, 12544 }
  0x17   : > { %s1794_s9 = scalar_lea.vmem %s2151_s0, %s1117_s6  ;;  %p1636_p12 = pnand %p1635_p11, %p1763_p5 }
  0x18   : > { %v172_v8 = vld [vmem:[%s1794_s9] sm:$0xff]  ;;  %v197_v9 = vld [vmem:[%s1794_s9 + $0xc8] sm:$0xff]  ;;  %v198_v11 = vld [vmem:[%s1794_s9 + $0xd0] sm:$0xff]  ;;  %p1642_p1 = scmp.lt.s32.totalorder %s1640_s5, %s1634_s29 }
  0x19   : > { %1235 = vmatmul.mubr.msk.f32.vlgmr.msra.gmra.mrb[0].mxu0 %vm232_vm4, %v172_v8  ;;  %1310 = vmatmul.mubr.msk.f32.vlgmr.msra.gmra.mrb[0].mxu1 %vm232_vm4, %v197_v9  ;;  %v173_v10 = vld [vmem:[%s1794_s9 + $0x8] sm:$0xff]  ;;  %v174_v12 = vld [vmem:[%s1794_s9 + $0x10] sm:$0xff]  ;;  %v199_v13 = vld [vmem:[%s1794_s9 + $0xd8] sm:$0xff]  ;;  %p1637_p13 = pneg %p1636_p12 }
  0x1a   : > { %1237 = vmatprep.mubr.msk.f32.mxu0 %vm1699_vm1, %v1700_v6  ;;  %1312 = vmatprep.mubr.msk.f32.mxu1 %vm1699_vm1, %v1700_v6  ;;  %v175_v14 = vld [vmem:[%s1794_s9 + $0x18] sm:$0xff]  ;;  %v200_v15 = vld [vmem:[%s1794_s9 + $0xe0] sm:$0xff]  ;;  %v201_v17 = vld [vmem:[%s1794_s9 + $0xe8] sm:$0xff]  ;;  %p1643_p2 = por %p1642_p1, %p1641_p0 }
  0x1b   : > { %v176_v16 = vld [vmem:[%s1794_s9 + $0x20] sm:$0xff]  ;;  %v177_v18 = vld [vmem:[%s1794_s9 + $0x28] sm:$0xff]  ;;  %v202_v19 = vld [vmem:[%s1794_s9 + $0xf0] sm:$0xff] }
  0x1c   : > { %v178_v20 = vld [vmem:[%s1794_s9 + $0x30] sm:$0xff]  ;;  %v203_v21 = vld [vmem:[%s1794_s9 + $0xf8] sm:$0xff]  ;;  %v204_v23 = vld [vmem:[%s1794_s9 + $0x100] sm:$0xff]  ;;  %p1644_p3 = pnand %p1643_p2, %p1637_p13 }
  0x1d   : > { %1238 = vmatmul.mubr.msk.f32.gmra.mrb[2].mxu0 %vm232_vm4, %v173_v10  ;;  %1313 = vmatmul.mubr.msk.f32.gmra.mrb[2].mxu1 %vm232_vm4, %v198_v11  ;;  %v179_v22 = vld [vmem:[%s1794_s9 + $0x38] sm:$0xff]  ;;  %v180_v24 = vld [vmem:[%s1794_s9 + $0x40] sm:$0xff]  ;;  %v205_v25 = vld [vmem:[%s1794_s9 + $0x108] sm:$0xff] }
  0x1e   : > { %1240 = vmatprep.mubr.msk.f32.mxu0 %vm1699_vm1, %v1700_v6  ;;  %1315 = vmatprep.mubr.msk.f32.mxu1 %vm1699_vm1, %v1700_v6  ;;  %v181_v26 = vld [vmem:[%s1794_s9 + $0x48] sm:$0xff]  ;;  %v206_v27 = vld [vmem:[%s1794_s9 + $0x110] sm:$0xff]  ;;  %v207_v29 = vld [vmem:[%s1794_s9 + $0x118] sm:$0xff] }
  0x1f   : > { %v182_v28 = vld [vmem:[%s1794_s9 + $0x50] sm:$0xff]  ;;  %v183_v30 = vld [vmem:[%s1794_s9 + $0x58] sm:$0xff]  ;;  %v208_v31 = vld [vmem:[%s1794_s9 + $0x120] sm:$0xff] }
  0x20   : > { %v184_v32 = vld [vmem:[%s1794_s9 + $0x60] sm:$0xff]  ;;  %v209_v33 = vld [vmem:[%s1794_s9 + $0x128] sm:$0xff]  ;;  %v210_v35 = vld [vmem:[%s1794_s9 + $0x130] sm:$0xff] }
  0x21   : > { %1241 = vmatmul.mubr.msk.f32.gmra.mrb[4].mxu0 %vm232_vm4, %v174_v12  ;;  %1316 = vmatmul.mubr.msk.f32.gmra.mrb[4].mxu1 %vm232_vm4, %v199_v13  ;;  %v185_v34 = vld [vmem:[%s1794_s9 + $0x68] sm:$0xff]  ;;  %v186_v36 = vld [vmem:[%s1794_s9 + $0x70] sm:$0xff]  ;;  %v211_v37 = vld [vmem:[%s1794_s9 + $0x138] sm:$0xff] }
  0x22   : > { %1243 = vmatprep.mubr.msk.f32.mxu0 %vm1699_vm1, %v1700_v6  ;;  %1318 = vmatprep.mubr.msk.f32.mxu1 %vm1699_vm1, %v1700_v6  ;;  %v187_v38 = vld [vmem:[%s1794_s9 + $0x78] sm:$0xff]  ;;  %v212_v39 = vld [vmem:[%s1794_s9 + $0x140] sm:$0xff]  ;;  %v213_v41 = vld [vmem:[%s1794_s9 + $0x148] sm:$0xff] }
  0x23   : > { %v188_v40 = vld [vmem:[%s1794_s9 + $0x80] sm:$0xff]  ;;  %v189_v42 = vld [vmem:[%s1794_s9 + $0x88] sm:$0xff]  ;;  %v214_v43 = vld [vmem:[%s1794_s9 + $0x150] sm:$0xff] }
  0x24   : > { %v190_v44 = vld [vmem:[%s1794_s9 + $0x90] sm:$0xff]  ;;  %v215_v45 = vld [vmem:[%s1794_s9 + $0x158] sm:$0xff]  ;;  %v216_v47 = vld [vmem:[%s1794_s9 + $0x160] sm:$0xff] }
  0x25   : > { %1244 = vmatmul.mubr.msk.f32.gmra.mrb[6].mxu0 %vm232_vm4, %v175_v14  ;;  %1319 = vmatmul.mubr.msk.f32.gmra.mrb[6].mxu1 %vm232_vm4, %v200_v15  ;;  %v191_v46 = vld [vmem:[%s1794_s9 + $0x98] sm:$0xff]  ;;  %v192_v48 = vld [vmem:[%s1794_s9 + $0xa0] sm:$0xff]  ;;  %v217_v49 = vld [vmem:[%s1794_s9 + $0x168] sm:$0xff] }
  0x26   : > { %1246 = vmatprep.mubr.msk.f32.mxu0 %vm1699_vm1, %v1700_v6  ;;  %1321 = vmatprep.mubr.msk.f32.mxu1 %vm1699_vm1, %v1700_v6  ;;  %v193_v50 = vld [vmem:[%s1794_s9 + $0xa8] sm:$0xff]  ;;  %v218_v51 = vld [vmem:[%s1794_s9 + $0x170] sm:$0xff]  ;;  %v219_v53 = vld [vmem:[%s1794_s9 + $0x178] sm:$0xff] }
  0x27   : > { %v194_v52 = vld [vmem:[%s1794_s9 + $0xb0] sm:$0xff]  ;;  %v195_v54 = vld [vmem:[%s1794_s9 + $0xb8] sm:$0xff]  ;;  %v220_v55 = vld [vmem:[%s1794_s9 + $0x180] sm:$0xff] }
  0x28   : > { %v196_v56 = vld [vmem:[%s1794_s9 + $0xc0] sm:$0xff] }
  0x29   : > { %1247 = vmatmul.mubr.msk.f32.gmra.mrb[8].mxu0 %vm232_vm4, %v176_v16  ;;  %1322 = vmatmul.mubr.msk.f32.gmra.mrb[8].mxu1 %vm232_vm4, %v201_v17 }
  0x2a   : > { %1249 = vmatprep.mubr.msk.f32.mxu0 %vm1699_vm1, %v1700_v6  ;;  %1324 = vmatprep.mubr.msk.f32.mxu1 %vm1699_vm1, %v1700_v6 }
  0x2d   : > { %1250 = vmatmul.mubr.msk.f32.gmra.mrb[10].mxu0 %vm232_vm4, %v177_v18  ;;  %1325 = vmatmul.mubr.msk.f32.gmra.mrb[10].mxu1 %vm232_vm4, %v202_v19 }
  0x2e   : > { %1252 = vmatprep.mubr.msk.f32.mxu0 %vm1699_vm1, %v1700_v6  ;;  %1327 = vmatprep.mubr.msk.f32.mxu1 %vm1699_vm1, %v1700_v6 }
  0x31   : > { %1253 = vmatmul.mubr.msk.f32.gmra.mrb[12].mxu0 %vm232_vm4, %v178_v20  ;;  %1328 = vmatmul.mubr.msk.f32.gmra.mrb[12].mxu1 %vm232_vm4, %v203_v21 }
  0x32   : > { %1255 = vmatprep.mubr.msk.f32.mxu0 %vm1699_vm1, %v1700_v6  ;;  %1330 = vmatprep.mubr.msk.f32.mxu1 %vm1699_vm1, %v1700_v6 }
  0x35   : > { %1256 = vmatmul.mubr.msk.f32.gmra.mrb[14].mxu0 %vm232_vm4, %v179_v22  ;;  %1331 = vmatmul.mubr.msk.f32.gmra.mrb[14].mxu1 %vm232_vm4, %v204_v23 }
  0x36   : > { %1258 = vmatprep.mubr.msk.f32.mxu0 %vm1699_vm1, %v1700_v6  ;;  %1333 = vmatprep.mubr.msk.f32.mxu1 %vm1699_vm1, %v1700_v6 }
  0x39   : > { %1259 = vmatmul.mubr.msk.f32.gmra.mrb[16].mxu0 %vm232_vm4, %v180_v24  ;;  %1334 = vmatmul.mubr.msk.f32.gmra.mrb[16].mxu1 %vm232_vm4, %v205_v25 }
  0x3a   : > { %1261 = vmatprep.mubr.msk.f32.mxu0 %vm1699_vm1, %v1700_v6  ;;  %1336 = vmatprep.mubr.msk.f32.mxu1 %vm1699_vm1, %v1700_v6 }
  0x3d   : > { %1262 = vmatmul.mubr.msk.f32.gmra.mrb[18].mxu0 %vm232_vm4, %v181_v26  ;;  %1337 = vmatmul.mubr.msk.f32.gmra.mrb[18].mxu1 %vm232_vm4, %v206_v27 }
  0x3e   : > { %1264 = vmatprep.mubr.msk.f32.mxu0 %vm1699_vm1, %v1700_v6  ;;  %1339 = vmatprep.mubr.msk.f32.mxu1 %vm1699_vm1, %v1700_v6 }
  0x41   : > { %1265 = vmatmul.mubr.msk.f32.gmra.mrb[20].mxu0 %vm232_vm4, %v182_v28  ;;  %1340 = vmatmul.mubr.msk.f32.gmra.mrb[20].mxu1 %vm232_vm4, %v207_v29 }
  0x42   : > { %1267 = vmatprep.mubr.msk.f32.mxu0 %vm1699_vm1, %v1700_v6  ;;  %1342 = vmatprep.mubr.msk.f32.mxu1 %vm1699_vm1, %v1700_v6 }
  0x45   : > { %1268 = vmatmul.mubr.msk.f32.gmra.mrb[22].mxu0 %vm232_vm4, %v183_v30  ;;  %1343 = vmatmul.mubr.msk.f32.gmra.mrb[22].mxu1 %vm232_vm4, %v208_v31 }
  0x46   : > { %1270 = vmatprep.mubr.msk.f32.mxu0 %vm1699_vm1, %v1700_v6  ;;  %1345 = vmatprep.mubr.msk.f32.mxu1 %vm1699_vm1, %v1700_v6 }
  0x49   : > { %1271 = vmatmul.mubr.msk.f32.gmra.mrb[24].mxu0 %vm232_vm4, %v184_v32  ;;  %1346 = vmatmul.mubr.msk.f32.gmra.mrb[24].mxu1 %vm232_vm4, %v209_v33 }
  0x4a   : > { %1273 = vmatprep.mubr.msk.f32.mxu0 %vm1699_vm1, %v1700_v6  ;;  %1348 = vmatprep.mubr.msk.f32.mxu1 %vm1699_vm1, %v1700_v6 }
  0x4d   : > { %1274 = vmatmul.mubr.msk.f32.gmra.mrb[26].mxu0 %vm232_vm4, %v185_v34  ;;  %1349 = vmatmul.mubr.msk.f32.gmra.mrb[26].mxu1 %vm232_vm4, %v210_v35 }
  0x4e   : > { %1276 = vmatprep.mubr.msk.f32.mxu0 %vm1699_vm1, %v1700_v6  ;;  %1351 = vmatprep.mubr.msk.f32.mxu1 %vm1699_vm1, %v1700_v6 }
  0x51   : > { %1277 = vmatmul.mubr.msk.f32.gmra.mrb[28].mxu0 %vm232_vm4, %v186_v36  ;;  %1352 = vmatmul.mubr.msk.f32.gmra.mrb[28].mxu1 %vm232_vm4, %v211_v37 }
  0x52   : > { %1279 = vmatprep.mubr.msk.f32.mxu0 %vm1699_vm1, %v1700_v6  ;;  %1354 = vmatprep.mubr.msk.f32.mxu1 %vm1699_vm1, %v1700_v6 }
  0x55   : > { %1280 = vmatmul.mubr.msk.f32.gmra.mrb[30].mxu0 %vm232_vm4, %v187_v38  ;;  %1355 = vmatmul.mubr.msk.f32.gmra.mrb[30].mxu1 %vm232_vm4, %v212_v39 }
  0x56   : > { %1282 = vmatprep.mubr.msk.f32.mxu0 %vm1699_vm1, %v1700_v6  ;;  %1357 = vmatprep.mubr.msk.f32.mxu1 %vm1699_vm1, %v1700_v6 }
  0x59   : > { %1283 = vmatmul.mubr.msk.f32.gmra.mrb[32].mxu0 %vm232_vm4, %v188_v40  ;;  %1358 = vmatmul.mubr.msk.f32.gmra.mrb[32].mxu1 %vm232_vm4, %v213_v41 }
  0x5a   : > { %1285 = vmatprep.mubr.msk.f32.mxu0 %vm1699_vm1, %v1700_v6  ;;  %1360 = vmatprep.mubr.msk.f32.mxu1 %vm1699_vm1, %v1700_v6 }
  0x5d   : > { %1286 = vmatmul.mubr.msk.f32.gmra.mrb[34].mxu0 %vm232_vm4, %v189_v42  ;;  %1361 = vmatmul.mubr.msk.f32.gmra.mrb[34].mxu1 %vm232_vm4, %v214_v43 }
  0x5e   : > { %1288 = vmatprep.mubr.msk.f32.mxu0 %vm1699_vm1, %v1700_v6  ;;  %1363 = vmatprep.mubr.msk.f32.mxu1 %vm1699_vm1, %v1700_v6 }
  0x61   : > { %1289 = vmatmul.mubr.msk.f32.gmra.mrb[36].mxu0 %vm232_vm4, %v190_v44  ;;  %1364 = vmatmul.mubr.msk.f32.gmra.mrb[36].mxu1 %vm232_vm4, %v215_v45 }
  0x62   : > { %1291 = vmatprep.mubr.msk.f32.mxu0 %vm1699_vm1, %v1700_v6  ;;  %1366 = vmatprep.mubr.msk.f32.mxu1 %vm1699_vm1, %v1700_v6 }
  0x65   : > { %1292 = vmatmul.mubr.msk.f32.gmra.mrb[38].mxu0 %vm232_vm4, %v191_v46  ;;  %1367 = vmatmul.mubr.msk.f32.gmra.mrb[38].mxu1 %vm232_vm4, %v216_v47 }
  0x66   : > { %1294 = vmatprep.mubr.msk.f32.mxu0 %vm1699_vm1, %v1700_v6  ;;  %1369 = vmatprep.mubr.msk.f32.mxu1 %vm1699_vm1, %v1700_v6 }
  0x69   : > { %1295 = vmatmul.mubr.msk.f32.gmra.mrb[40].mxu0 %vm232_vm4, %v192_v48  ;;  %1370 = vmatmul.mubr.msk.f32.gmra.mrb[40].mxu1 %vm232_vm4, %v217_v49 }
  0x6a   : > { %1297 = vmatprep.mubr.msk.f32.mxu0 %vm1699_vm1, %v1700_v6  ;;  %1372 = vmatprep.mubr.msk.f32.mxu1 %vm1699_vm1, %v1700_v6 }
  0x6d   : > { %1298 = vmatmul.mubr.msk.f32.gmra.mrb[42].mxu0 %vm232_vm4, %v193_v50  ;;  %1373 = vmatmul.mubr.msk.f32.gmra.mrb[42].mxu1 %vm232_vm4, %v218_v51 }
  0x6e   : > { %1300 = vmatprep.mubr.msk.f32.mxu0 %vm1699_vm1, %v1700_v6  ;;  %1375 = vmatprep.mubr.msk.f32.mxu1 %vm1699_vm1, %v1700_v6 }
  0x71   : > { %1301 = vmatmul.mubr.msk.f32.gmra.mrb[44].mxu0 %vm232_vm4, %v194_v52  ;;  %1376 = vmatmul.mubr.msk.f32.gmra.mrb[44].mxu1 %vm232_vm4, %v219_v53 }
  0x72   : > { %1303 = vmatprep.mubr.msk.f32.mxu0 %vm1699_vm1, %v1700_v6  ;;  %1378 = vmatprep.mubr.msk.f32.mxu1 %vm1699_vm1, %v1700_v6 }
  0x75   : > { %1304 = vmatmul.mubr.msk.f32.gmra.mrb[46].mxu0 %vm232_vm4, %v195_v54  ;;  %1379 = vmatmul.mubr.msk.f32.gmra.mrb[46].mxu1 %vm232_vm4, %v220_v55 }
  0x76   : > { %1306 = vmatprep.mubr.msk.f32.mxu0 %vm1699_vm1, %v1700_v6 }
  0x79   : > { %1307 = vmatmul.mubr.msk.f32.gmra.mrb[48].mxu0 %vm232_vm4, %v196_v56 }
  0xec   : > { %v450_v58 = vpop.f32.mrb[0].mxu0  ;;  %v575_v59 = vpop.f32.mrb[0].mxu1 }
  0xed   : > { %v451_v60 = vadd.f32 %v1991_v57, %v450_v58  ;;  %v1236_v61 = vpop.f32.mrb[1].mxu0  ;;  %v576_v62 = vadd.f32 %v1991_v57, %v575_v59  ;;  %v1311_v63 = vpop.f32.mrb[1].mxu1 }
  0xef   : > { %v694_v0 = vsub.f32 0.0, %v451_v60  ;;  %v719_v1 = vsub.f32 0.0, %v576_v62 }
  0xf0   : > { %v455_v2 = vpop.f32.mrb[2].mxu0  ;;  %v580_v3 = vpop.f32.mrb[2].mxu1 }
  0xf1   : > { %v743_v4 = vmul.f32 1.442695, %v694_v0  ;;  %v793_v5 = vmul.f32 1.442695, %v719_v1  ;;  %v456_v6 = vadd.f32 %v1991_v57, %v455_v2  ;;  %v1239_v7 = vpop.f32.mrb[3].mxu0  ;;  %v581_v8 = vadd.f32 %v1991_v57, %v580_v3  ;;  %v1314_v9 = vpop.f32.mrb[3].mxu1 }
  0xf3   : > { %1438 = vpow2.f32 %v743_v4  ;;  %v695_v10 = vsub.f32 0.0, %v456_v6  ;;  %v720_v11 = vsub.f32 0.0, %v581_v8 }
  0xf4   : > { %1440 = vpow2.f32 %v793_v5  ;;  %v460_v12 = vpop.f32.mrb[4].mxu0  ;;  %v585_v13 = vpop.f32.mrb[4].mxu1 }
  0xf5   : > { %v745_v14 = vmul.f32 1.442695, %v695_v10  ;;  %v795_v15 = vmul.f32 1.442695, %v720_v11  ;;  %v461_v16 = vadd.f32 %v1991_v57, %v460_v12  ;;  %v1242_v17 = vpop.f32.mrb[5].mxu0  ;;  %v586_v18 = vadd.f32 %v1991_v57, %v585_v13  ;;  %v1317_v19 = vpop.f32.mrb[5].mxu1 }
  0xf7   : > { %1442 = vpow2.f32 %v745_v14  ;;  %v696_v20 = vsub.f32 0.0, %v461_v16  ;;  %v721_v21 = vsub.f32 0.0, %v586_v18 }
  0xf8   : > { %1444 = vpow2.f32 %v795_v15  ;;  %v465_v22 = vpop.f32.mrb[6].mxu0  ;;  %v590_v23 = vpop.f32.mrb[6].mxu1 }
  0xf9   : > { %v747_v24 = vmul.f32 1.442695, %v696_v20  ;;  %v797_v25 = vmul.f32 1.442695, %v721_v21  ;;  %v466_v26 = vadd.f32 %v1991_v57, %v465_v22  ;;  %v1245_v27 = vpop.f32.mrb[7].mxu0  ;;  %v591_v28 = vadd.f32 %v1991_v57, %v590_v23  ;;  %v1320_v29 = vpop.f32.mrb[7].mxu1 }
  0xfb   : > { %1446 = vpow2.f32 %v747_v24  ;;  %v697_v30 = vsub.f32 0.0, %v466_v26  ;;  %v722_v31 = vsub.f32 0.0, %v591_v28 }
  0xfc   : > { %1448 = vpow2.f32 %v797_v25  ;;  %v470_v32 = vpop.f32.mrb[8].mxu0  ;;  %v595_v33 = vpop.f32.mrb[8].mxu1 }
  0xfd   : > { %v1439_v34 = vpop.eup %1438  ;;  %v749_v35 = vmul.f32 1.442695, %v697_v30  ;;  %v471_v36 = vadd.f32 %v1991_v57, %v470_v32  ;;  %v1248_v37 = vpop.f32.mrb[9].mxu0  ;;  %v596_v38 = vadd.f32 %v1991_v57, %v595_v33  ;;  %v799_v42 = vmul.f32 1.442695, %v722_v31 }
  0xfe   : > { %v1323_v39 = vpop.f32.mrb[9].mxu1  ;;  %v1441_v40 = vpop.eup %1440  ;;  %v841_v41 = vadd.f32 1.0, %v1439_v34 }
  0xff   : > { %v866_v43 = vadd.f32 1.0, %v1441_v40  ;;  %1450 = vpow2.f32 %v749_v35  ;;  %v698_v44 = vsub.f32 0.0, %v471_v36  ;;  %v723_v45 = vsub.f32 0.0, %v596_v38 }
 0x100   : > { %1452 = vrcp.f32 %v841_v41  ;;  %v475_v46 = vpop.f32.mrb[10].mxu0  ;;  %v600_v47 = vpop.f32.mrb[10].mxu1 }
 0x101   : > { %v1443_v48 = vpop.eup %1442  ;;  %1454 = vrcp.f32 %v866_v43  ;;  %v751_v49 = vmul.f32 1.442695, %v698_v44  ;;  %v476_v50 = vadd.f32 %v1991_v57, %v475_v46  ;;  %v1251_v51 = vpop.f32.mrb[11].mxu0  ;;  %v801_v55 = vmul.f32 1.442695, %v723_v45 }
 0x102   : > { %v1326_v52 = vpop.f32.mrb[11].mxu1  ;;  %v1445_v53 = vpop.eup %1444  ;;  %v842_v54 = vadd.f32 1.0, %v1443_v48  ;;  %1456 = vpow2.f32 %v799_v42  ;;  %v601_v56 = vadd.f32 %v1991_v57, %v600_v47 }
 0x103   : > { %v867_v58 = vadd.f32 1.0, %v1445_v53  ;;  %1458 = vpow2.f32 %v751_v49  ;;  %v699_v59 = vsub.f32 0.0, %v476_v50 }
 0x104   : > { %1460 = vrcp.f32 %v842_v54  ;;  %v724_v60 = vsub.f32 0.0, %v601_v56  ;;  %v480_v61 = vpop.f32.mrb[12].mxu0  ;;  %v605_v62 = vpop.f32.mrb[12].mxu1 }
 0x105   : > { %v1447_v63 = vpop.eup %1446  ;;  %1462 = vrcp.f32 %v867_v58  ;;  %v753_v0 = vmul.f32 1.442695, %v699_v59  ;;  %v481_v1 = vadd.f32 %v1991_v57, %v480_v61  ;;  %v1254_v2 = vpop.f32.mrb[13].mxu0  ;;  %v606_v3 = vadd.f32 %v1991_v57, %v605_v62 }
 0x106   : > { %v1329_v4 = vpop.f32.mrb[13].mxu1  ;;  %v1449_v5 = vpop.eup %1448  ;;  %v843_v6 = vadd.f32 1.0, %v1447_v63  ;;  %1464 = vpow2.f32 %v801_v55  ;;  %v803_v7 = vmul.f32 1.442695, %v724_v60 }
 0x107   : > { %v868_v8 = vadd.f32 1.0, %v1449_v5  ;;  %1466 = vpow2.f32 %v753_v0  ;;  %v700_v9 = vsub.f32 0.0, %v481_v1  ;;  %v725_v10 = vsub.f32 0.0, %v606_v3 }
 0x108   : > { %1468 = vrcp.f32 %v843_v6  ;;  %v485_v11 = vpop.f32.mrb[14].mxu0  ;;  %v610_v12 = vpop.f32.mrb[14].mxu1 }
 0x109   : > { %v1451_v13 = vpop.eup %1450  ;;  %1470 = vrcp.f32 %v868_v8  ;;  %v755_v14 = vmul.f32 1.442695, %v700_v9  ;;  %v805_v15 = vmul.f32 1.442695, %v725_v10  ;;  %v486_v16 = vadd.f32 %v1991_v57, %v485_v11  ;;  %v1257_v17 = vpop.f32.mrb[15].mxu0 }
 0x10a   : > { %v1332_v18 = vpop.f32.mrb[15].mxu1  ;;  %v1453_v19 = vpop.eup %1452  ;;  %v844_v20 = vadd.f32 1.0, %v1451_v13  ;;  %1472 = vpow2.f32 %v803_v7  ;;  %v611_v21 = vadd.f32 %v1991_v57, %v610_v12 }
 0x10b   : > { %v1455_v22 = vpop.eup %1454  ;;  %988 = vst [vmem:[%s2015_s20] sm:$0xff] %v1453_v19  ;;  %1474 = vpow2.f32 %v755_v14  ;;  %v701_v23 = vsub.f32 0.0, %v486_v16 }
 0x10c   : > { %v1457_v24 = vpop.eup %1456  ;;  %1013 = vst [vmem:[%s2015_s20 + $0xc8] sm:$0xff] %v1455_v22  ;;  %1476 = vrcp.f32 %v844_v20  ;;  %v726_v25 = vsub.f32 0.0, %v611_v21  ;;  %v490_v26 = vpop.f32.mrb[16].mxu0 }
 0x10d   : > { %v615_v27 = vpop.f32.mrb[16].mxu1  ;;  %v1459_v28 = vpop.eup %1458  ;;  %v869_v29 = vadd.f32 1.0, %v1457_v24  ;;  %1478 = vpow2.f32 %v805_v15  ;;  %v757_v30 = vmul.f32 1.442695, %v701_v23  ;;  %v491_v31 = vadd.f32 %v1991_v57, %v490_v26 }
 0x10e   : > { %v1260_v32 = vpop.f32.mrb[17].mxu0  ;;  %v1335_v33 = vpop.f32.mrb[17].mxu1  ;;  %v845_v35 = vadd.f32 1.0, %v1459_v28  ;;  %v807_v36 = vmul.f32 1.442695, %v726_v25  ;;  %v616_v37 = vadd.f32 %v1991_v57, %v615_v27 }
 0x10f   : > { %v1461_v34 = vpop.eup %1460  ;;  %1480 = vrcp.f32 %v869_v29  ;;  %v702_v39 = vsub.f32 0.0, %v491_v31 }
 0x110   : > { %v1463_v38 = vpop.eup %1462  ;;  %989 = vst [vmem:[%s2015_s20 + $0x8] sm:$0xff] %v1461_v34  ;;  %1482 = vrcp.f32 %v845_v35  ;;  %v727_v41 = vsub.f32 0.0, %v616_v37  ;;  %v495_v42 = vpop.f32.mrb[18].mxu0 }
 0x111   : > { %v1465_v40 = vpop.eup %1464  ;;  %1014 = vst [vmem:[%s2015_s20 + $0xd0] sm:$0xff] %v1463_v38  ;;  %v620_v43 = vpop.f32.mrb[18].mxu1  ;;  %1484 = vpow2.f32 %v757_v30  ;;  %v759_v46 = vmul.f32 1.442695, %v702_v39  ;;  %v496_v47 = vadd.f32 %v1991_v57, %v495_v42 }
 0x112   : > { %v1467_v44 = vpop.eup %1466  ;;  %v870_v45 = vadd.f32 1.0, %v1465_v40  ;;  %v1263_v48 = vpop.f32.mrb[19].mxu0  ;;  %1486 = vpow2.f32 %v807_v36  ;;  %v809_v52 = vmul.f32 1.442695, %v727_v41  ;;  %v621_v53 = vadd.f32 %v1991_v57, %v620_v43 }
 0x113   : > { %v1338_v49 = vpop.f32.mrb[19].mxu1  ;;  %v1469_v50 = vpop.eup %1468  ;;  %v846_v51 = vadd.f32 1.0, %v1467_v44  ;;  %v703_v55 = vsub.f32 0.0, %v496_v47 }
 0x114   : > { %v1471_v54 = vpop.eup %1470  ;;  %990 = vst [vmem:[%s2015_s20 + $0x10] sm:$0xff] %v1469_v50  ;;  %1488 = vrcp.f32 %v870_v45  ;;  %v728_v58 = vsub.f32 0.0, %v621_v53  ;;  %v500_v59 = vpop.f32.mrb[20].mxu0 }
 0x115   : > { %v1473_v56 = vpop.eup %1472  ;;  %1015 = vst [vmem:[%s2015_s20 + $0xd8] sm:$0xff] %v1471_v54  ;;  %1490 = vrcp.f32 %v846_v51  ;;  %v625_v60 = vpop.f32.mrb[20].mxu1  ;;  %v761_v63 = vmul.f32 1.442695, %v703_v55  ;;  %v501_v0 = vadd.f32 %v1991_v57, %v500_v59 }
 0x116   : > { %v1475_v61 = vpop.eup %1474  ;;  %v871_v62 = vadd.f32 1.0, %v1473_v56  ;;  %1492 = vpow2.f32 %v759_v46  ;;  %v1266_v1 = vpop.f32.mrb[21].mxu0  ;;  %v626_v5 = vadd.f32 %v1991_v57, %v625_v60  ;;  %v811_v7 = vmul.f32 1.442695, %v728_v58 }
 0x117   : > { %v1341_v2 = vpop.f32.mrb[21].mxu1  ;;  %v1477_v3 = vpop.eup %1476  ;;  %v847_v4 = vadd.f32 1.0, %v1475_v61  ;;  %1494 = vpow2.f32 %v809_v52  ;;  %v704_v8 = vsub.f32 0.0, %v501_v0 }
 0x118   : > { %v1479_v6 = vpop.eup %1478  ;;  %991 = vst [vmem:[%s2015_s20 + $0x18] sm:$0xff] %v1477_v3  ;;  %1496 = vrcp.f32 %v871_v62  ;;  %v729_v10 = vsub.f32 0.0, %v626_v5  ;;  %v505_v11 = vpop.f32.mrb[22].mxu0 }
 0x119   : > { %1498 = vrcp.f32 %v847_v4  ;;  %v872_v9 = vadd.f32 1.0, %v1479_v6  ;;  %v630_v12 = vpop.f32.mrb[22].mxu1  ;;  %v1481_v13 = vpop.eup %1480  ;;  %v763_v14 = vmul.f32 1.442695, %v704_v8  ;;  %v506_v15 = vadd.f32 %v1991_v57, %v505_v11 }
 0x11a   : > { %1500 = vpow2.f32 %v761_v63  ;;  %v1269_v16 = vpop.f32.mrb[23].mxu0  ;;  %v631_v17 = vadd.f32 %v1991_v57, %v630_v12  ;;  %v1344_v18 = vpop.f32.mrb[23].mxu1  ;;  %1016 = vst [vmem:[%s2015_s20 + $0xe0] sm:$0xff] %v1481_v13  ;;  %v813_v20 = vmul.f32 1.442695, %v729_v10 }
 0x11b   : > { %v1483_v19 = vpop.eup %1482  ;;  %1502 = vrcp.f32 %v872_v9  ;;  %v705_v22 = vsub.f32 0.0, %v506_v15 }
 0x11c   : > { %v1485_v21 = vpop.eup %1484  ;;  %992 = vst [vmem:[%s2015_s20 + $0x20] sm:$0xff] %v1483_v19  ;;  %1504 = vpow2.f32 %v811_v7  ;;  %v730_v23 = vsub.f32 0.0, %v631_v17  ;;  %v510_v26 = vpop.f32.mrb[24].mxu0 }
 0x11d   : > { %v1487_v24 = vpop.eup %1486  ;;  %v848_v25 = vadd.f32 1.0, %v1485_v21  ;;  %1506 = vpow2.f32 %v763_v14  ;;  %v635_v27 = vpop.f32.mrb[24].mxu1  ;;  %v765_v30 = vmul.f32 1.442695, %v705_v22  ;;  %v511_v34 = vadd.f32 %v1991_v57, %v510_v26 }
 0x11e   : > { %v1489_v28 = vpop.eup %1488  ;;  %v873_v29 = vadd.f32 1.0, %v1487_v24  ;;  %1508 = vpow2.f32 %v813_v20  ;;  %v815_v31 = vmul.f32 1.442695, %v730_v23  ;;  %v1272_v32 = vpop.f32.mrb[25].mxu0  ;;  %v636_v35 = vadd.f32 %v1991_v57, %v635_v27 }
 0x11f   : > { %v1491_v33 = vpop.eup %1490  ;;  %1017 = vst [vmem:[%s2015_s20 + $0xe8] sm:$0xff] %v1489_v28  ;;  %1510 = vrcp.f32 %v848_v25  ;;  %v1347_v36 = vpop.f32.mrb[25].mxu1  ;;  %v706_v40 = vsub.f32 0.0, %v511_v34 }
 0x120   : > { %v1493_v37 = vpop.eup %1492  ;;  %993 = vst [vmem:[%s2015_s20 + $0x28] sm:$0xff] %v1491_v33  ;;  %1512 = vrcp.f32 %v873_v29  ;;  %v731_v41 = vsub.f32 0.0, %v636_v35  ;;  %v515_v42 = vpop.f32.mrb[26].mxu0 }
 0x121   : > { %v1495_v38 = vpop.eup %1494  ;;  %v849_v39 = vadd.f32 1.0, %v1493_v37  ;;  %1514 = vpow2.f32 %v765_v30  ;;  %v640_v43 = vpop.f32.mrb[26].mxu1  ;;  %v516_v46 = vadd.f32 %v1991_v57, %v515_v42  ;;  %v767_v51 = vmul.f32 1.442695, %v706_v40 }
 0x122   : > { %v1497_v44 = vpop.eup %1496  ;;  %v874_v45 = vadd.f32 1.0, %v1495_v38  ;;  %1516 = vpow2.f32 %v815_v31  ;;  %v1275_v47 = vpop.f32.mrb[27].mxu0  ;;  %v641_v48 = vadd.f32 %v1991_v57, %v640_v43  ;;  %v817_v52 = vmul.f32 1.442695, %v731_v41 }
 0x123   : > { %v1350_v49 = vpop.f32.mrb[27].mxu1  ;;  %v1499_v50 = vpop.eup %1498  ;;  %1018 = vst [vmem:[%s2015_s20 + $0xf0] sm:$0xff] %v1497_v44  ;;  %1518 = vrcp.f32 %v849_v39  ;;  %v707_v54 = vsub.f32 0.0, %v516_v46 }
 0x124   : > { %v1501_v53 = vpop.eup %1500  ;;  %994 = vst [vmem:[%s2015_s20 + $0x30] sm:$0xff] %v1499_v50  ;;  %1520 = vrcp.f32 %v874_v45  ;;  %v732_v55 = vsub.f32 0.0, %v641_v48  ;;  %v520_v59 = vpop.f32.mrb[28].mxu0 }
 0x125   : > { %v1503_v56 = vpop.eup %1502  ;;  %v850_v58 = vadd.f32 1.0, %v1501_v53  ;;  %1522 = vpow2.f32 %v767_v51  ;;  %v645_v60 = vpop.f32.mrb[28].mxu1  ;;  %v769_v62 = vmul.f32 1.442695, %v707_v54  ;;  %v521_v63 = vadd.f32 %v1991_v57, %v520_v59 }
 0x126   : > { %v1505_v61 = vpop.eup %1504  ;;  %1019 = vst [vmem:[%s2015_s20 + $0xf8] sm:$0xff] %v1503_v56  ;;  %1524 = vpow2.f32 %v817_v52  ;;  %v1278_v0 = vpop.f32.mrb[29].mxu0  ;;  %v646_v4 = vadd.f32 %v1991_v57, %v645_v60  ;;  %v819_v7 = vmul.f32 1.442695, %v732_v55 }
 0x127   : > { %v1353_v1 = vpop.f32.mrb[29].mxu1  ;;  %v1507_v2 = vpop.eup %1506  ;;  %1526 = vrcp.f32 %v850_v58  ;;  %v875_v3 = vadd.f32 1.0, %v1505_v61  ;;  %v708_v8 = vsub.f32 0.0, %v521_v63 }
 0x128   : > { %v1509_v5 = vpop.eup %1508  ;;  %v851_v6 = vadd.f32 1.0, %v1507_v2  ;;  %1528 = vpow2.f32 %v769_v62  ;;  %v733_v11 = vsub.f32 0.0, %v646_v4  ;;  %v525_v12 = vpop.f32.mrb[30].mxu0 }
 0x129   : > { %v1511_v9 = vpop.eup %1510  ;;  %1530 = vrcp.f32 %v875_v3  ;;  %v876_v10 = vadd.f32 1.0, %v1509_v5  ;;  %v650_v13 = vpop.f32.mrb[30].mxu1  ;;  %v771_v15 = vmul.f32 1.442695, %v708_v8  ;;  %v526_v16 = vadd.f32 %v1991_v57, %v525_v12 }
 0x12a   : > { %v1513_v14 = vpop.eup %1512  ;;  %995 = vst [vmem:[%s2015_s20 + $0x38] sm:$0xff] %v1511_v9  ;;  %1532 = vrcp.f32 %v851_v6  ;;  %v1281_v17 = vpop.f32.mrb[31].mxu0  ;;  %v651_v18 = vadd.f32 %v1991_v57, %v650_v13  ;;  %v821_v21 = vmul.f32 1.442695, %v733_v11 }
 0x12b   : > { %v1356_v19 = vpop.f32.mrb[31].mxu1  ;;  %v1515_v20 = vpop.eup %1514  ;;  %1020 = vst [vmem:[%s2015_s20 + $0x100] sm:$0xff] %v1513_v14  ;;  %1534 = vrcp.f32 %v876_v10  ;;  %v709_v24 = vsub.f32 0.0, %v526_v16 }
 0x12c   : > { %v1517_v22 = vpop.eup %1516  ;;  %v852_v23 = vadd.f32 1.0, %v1515_v20  ;;  %1536 = vpow2.f32 %v819_v7  ;;  %v734_v25 = vsub.f32 0.0, %v651_v18  ;;  %v530_v28 = vpop.f32.mrb[32].mxu0 }
 0x12d   : > { %v1519_v26 = vpop.eup %1518  ;;  %v877_v27 = vadd.f32 1.0, %v1517_v22  ;;  %1538 = vpow2.f32 %v771_v15  ;;  %v655_v29 = vpop.f32.mrb[32].mxu1  ;;  %v773_v31 = vmul.f32 1.442695, %v709_v24  ;;  %v531_v32 = vadd.f32 %v1991_v57, %v530_v28 }
 0x12e   : > { %v1521_v30 = vpop.eup %1520  ;;  %996 = vst [vmem:[%s2015_s20 + $0x40] sm:$0xff] %v1519_v26  ;;  %1540 = vrcp.f32 %v852_v23  ;;  %v1284_v33 = vpop.f32.mrb[33].mxu0  ;;  %v656_v36 = vadd.f32 %v1991_v57, %v655_v29  ;;  %v823_v39 = vmul.f32 1.442695, %v734_v25 }
 0x12f   : > { %v1359_v34 = vpop.f32.mrb[33].mxu1  ;;  %v1523_v35 = vpop.eup %1522  ;;  %1021 = vst [vmem:[%s2015_s20 + $0x108] sm:$0xff] %v1521_v30  ;;  %1542 = vrcp.f32 %v877_v27  ;;  %v710_v40 = vsub.f32 0.0, %v531_v32 }
 0x130   : > { %v1525_v37 = vpop.eup %1524  ;;  %v853_v38 = vadd.f32 1.0, %v1523_v35  ;;  %1544 = vpow2.f32 %v821_v21  ;;  %v735_v43 = vsub.f32 0.0, %v656_v36  ;;  %v535_v44 = vpop.f32.mrb[34].mxu0 }
 0x131   : > { %v1527_v41 = vpop.eup %1526  ;;  %v878_v42 = vadd.f32 1.0, %v1525_v37  ;;  %1546 = vpow2.f32 %v773_v31  ;;  %v660_v45 = vpop.f32.mrb[34].mxu1  ;;  %v775_v47 = vmul.f32 1.442695, %v710_v40  ;;  %v536_v48 = vadd.f32 %v1991_v57, %v535_v44 }
 0x132   : > { %v1529_v46 = vpop.eup %1528  ;;  %997 = vst [vmem:[%s2015_s20 + $0x48] sm:$0xff] %v1527_v41  ;;  %1548 = vrcp.f32 %v853_v38  ;;  %v1287_v49 = vpop.f32.mrb[35].mxu0  ;;  %v661_v50 = vadd.f32 %v1991_v57, %v660_v45  ;;  %v825_v54 = vmul.f32 1.442695, %v735_v43 }
 0x133   : > { %v1362_v51 = vpop.f32.mrb[35].mxu1  ;;  %v1531_v52 = vpop.eup %1530  ;;  %1550 = vrcp.f32 %v878_v42  ;;  %v854_v53 = vadd.f32 1.0, %v1529_v46  ;;  %v711_v56 = vsub.f32 0.0, %v536_v48 }
 0x134   : > { %v1533_v55 = vpop.eup %1532  ;;  %1022 = vst [vmem:[%s2015_s20 + $0x110] sm:$0xff] %v1531_v52  ;;  %1552 = vpow2.f32 %v823_v39  ;;  %v736_v58 = vsub.f32 0.0, %v661_v50  ;;  %v540_v60 = vpop.f32.mrb[36].mxu0 }
 0x135   : > { %v1535_v59 = vpop.eup %1534  ;;  %998 = vst [vmem:[%s2015_s20 + $0x50] sm:$0xff] %v1533_v55  ;;  %1554 = vrcp.f32 %v854_v53  ;;  %v665_v61 = vpop.f32.mrb[36].mxu1  ;;  %v777_v63 = vmul.f32 1.442695, %v711_v56  ;;  %v541_v0 = vadd.f32 %v1991_v57, %v540_v60 }
 0x136   : > { %v1537_v62 = vpop.eup %1536  ;;  %1023 = vst [vmem:[%s2015_s20 + $0x118] sm:$0xff] %v1535_v59  ;;  %1556 = vpow2.f32 %v775_v47  ;;  %v1290_v1 = vpop.f32.mrb[37].mxu0  ;;  %v827_v5 = vmul.f32 1.442695, %v736_v58  ;;  %v666_v6 = vadd.f32 %v1991_v57, %v665_v61 }
 0x137   : > { %v1365_v2 = vpop.f32.mrb[37].mxu1  ;;  %v1539_v3 = vpop.eup %1538  ;;  %v879_v4 = vadd.f32 1.0, %v1537_v62  ;;  %1558 = vpow2.f32 %v825_v54  ;;  %v712_v9 = vsub.f32 0.0, %v541_v0 }
 0x138   : > { %v1541_v7 = vpop.eup %1540  ;;  %v855_v8 = vadd.f32 1.0, %v1539_v3  ;;  %1560 = vpow2.f32 %v777_v63  ;;  %v737_v11 = vsub.f32 0.0, %v666_v6  ;;  %v545_v12 = vpop.f32.mrb[38].mxu0 }
 0x139   : > { %v1543_v10 = vpop.eup %1542  ;;  %999 = vst [vmem:[%s2015_s20 + $0x58] sm:$0xff] %v1541_v7  ;;  %1562 = vrcp.f32 %v879_v4  ;;  %v670_v13 = vpop.f32.mrb[38].mxu1  ;;  %v779_v15 = vmul.f32 1.442695, %v712_v9  ;;  %v546_v16 = vadd.f32 %v1991_v57, %v545_v12 }
 0x13a   : > { %v1545_v14 = vpop.eup %1544  ;;  %1024 = vst [vmem:[%s2015_s20 + $0x120] sm:$0xff] %v1543_v10  ;;  %1564 = vrcp.f32 %v855_v8  ;;  %v1293_v17 = vpop.f32.mrb[39].mxu0  ;;  %v671_v18 = vadd.f32 %v1991_v57, %v670_v13  ;;  %v829_v22 = vmul.f32 1.442695, %v737_v11 }
 0x13b   : > { %v1368_v19 = vpop.f32.mrb[39].mxu1  ;;  %v1547_v20 = vpop.eup %1546  ;;  %v880_v21 = vadd.f32 1.0, %v1545_v14  ;;  %1566 = vpow2.f32 %v827_v5  ;;  %v713_v25 = vsub.f32 0.0, %v546_v16 }
 0x13c   : > { %v1549_v23 = vpop.eup %1548  ;;  %v856_v24 = vadd.f32 1.0, %v1547_v20  ;;  %1568 = vpow2.f32 %v779_v15  ;;  %v738_v26 = vsub.f32 0.0, %v671_v18  ;;  %v550_v28 = vpop.f32.mrb[40].mxu0 }
 0x13d   : > { %v1551_v27 = vpop.eup %1550  ;;  %1000 = vst [vmem:[%s2015_s20 + $0x60] sm:$0xff] %v1549_v23  ;;  %1570 = vrcp.f32 %v880_v21  ;;  %v675_v29 = vpop.f32.mrb[40].mxu1  ;;  %v781_v31 = vmul.f32 1.442695, %v713_v25  ;;  %v551_v33 = vadd.f32 %v1991_v57, %v550_v28 }
 0x13e   : > { %v1553_v30 = vpop.eup %1552  ;;  %1025 = vst [vmem:[%s2015_s20 + $0x128] sm:$0xff] %v1551_v27  ;;  %1572 = vrcp.f32 %v856_v24  ;;  %v831_v32 = vmul.f32 1.442695, %v738_v26  ;;  %v1296_v34 = vpop.f32.mrb[41].mxu0  ;;  %v676_v38 = vadd.f32 %v1991_v57, %v675_v29 }
 0x13f   : > { %v1371_v35 = vpop.f32.mrb[41].mxu1  ;;  %v1555_v36 = vpop.eup %1554  ;;  %v881_v37 = vadd.f32 1.0, %v1553_v30  ;;  %1574 = vpow2.f32 %v829_v22  ;;  %v714_v40 = vsub.f32 0.0, %v551_v33 }
 0x140   : > { %v1557_v39 = vpop.eup %1556  ;;  %1001 = vst [vmem:[%s2015_s20 + $0x68] sm:$0xff] %v1555_v36  ;;  %1576 = vpow2.f32 %v781_v31  ;;  %v739_v43 = vsub.f32 0.0, %v676_v38  ;;  %v555_v44 = vpop.f32.mrb[42].mxu0 }
 0x141   : > { %v1559_v41 = vpop.eup %1558  ;;  %1578 = vrcp.f32 %v881_v37  ;;  %v857_v42 = vadd.f32 1.0, %v1557_v39  ;;  %v680_v45 = vpop.f32.mrb[42].mxu1  ;;  %v783_v48 = vmul.f32 1.442695, %v714_v40  ;;  %v556_v49 = vadd.f32 %v1991_v57, %v555_v44 }
 0x142   : > { %v1561_v46 = vpop.eup %1560  ;;  %v882_v47 = vadd.f32 1.0, %v1559_v41  ;;  %1580 = vpow2.f32 %v831_v32  ;;  %v1299_v50 = vpop.f32.mrb[43].mxu0  ;;  %v833_v54 = vmul.f32 1.442695, %v739_v43  ;;  %v681_v55 = vadd.f32 %v1991_v57, %v680_v45 }
 0x143   : > { %v1374_v51 = vpop.f32.mrb[43].mxu1  ;;  %v1563_v52 = vpop.eup %1562  ;;  %1582 = vrcp.f32 %v857_v42  ;;  %v858_v53 = vadd.f32 1.0, %v1561_v46  ;;  %v715_v58 = vsub.f32 0.0, %v556_v49 }
 0x144   : > { %v1565_v56 = vpop.eup %1564  ;;  %1026 = vst [vmem:[%s2015_s20 + $0x130] sm:$0xff] %v1563_v52  ;;  %1584 = vrcp.f32 %v882_v47  ;;  %v740_v60 = vsub.f32 0.0, %v681_v55  ;;  %v560_v61 = vpop.f32.mrb[44].mxu0 }
 0x145   : > { %v1567_v59 = vpop.eup %1566  ;;  %1002 = vst [vmem:[%s2015_s20 + $0x70] sm:$0xff] %v1565_v56  ;;  %1586 = vrcp.f32 %v858_v53  ;;  %v685_v62 = vpop.f32.mrb[44].mxu1  ;;  %v785_v1 = vmul.f32 1.442695, %v715_v58  ;;  %v561_v2 = vadd.f32 %v1991_v57, %v560_v61 }
 0x146   : > { %v1569_v63 = vpop.eup %1568  ;;  %v883_v0 = vadd.f32 1.0, %v1567_v59  ;;  %1588 = vpow2.f32 %v783_v48  ;;  %v1302_v3 = vpop.f32.mrb[45].mxu0  ;;  %v835_v7 = vmul.f32 1.442695, %v740_v60  ;;  %v686_v8 = vadd.f32 %v1991_v57, %v685_v62 }
 0x147   : > { %v1377_v4 = vpop.f32.mrb[45].mxu1  ;;  %v1571_v5 = vpop.eup %1570  ;;  %v859_v6 = vadd.f32 1.0, %v1569_v63  ;;  %1590 = vpow2.f32 %v833_v54  ;;  %v716_v10 = vsub.f32 0.0, %v561_v2 }
 0x148   : > { %v1573_v9 = vpop.eup %1572  ;;  %1027 = vst [vmem:[%s2015_s20 + $0x138] sm:$0xff] %v1571_v5  ;;  %1592 = vrcp.f32 %v883_v0  ;;  %v741_v12 = vsub.f32 0.0, %v686_v8  ;;  %v565_v13 = vpop.f32.mrb[46].mxu0 }
 0x149   : > { %v1575_v11 = vpop.eup %1574  ;;  %1003 = vst [vmem:[%s2015_s20 + $0x78] sm:$0xff] %v1573_v9  ;;  %1594 = vrcp.f32 %v859_v6  ;;  %v690_v14 = vpop.f32.mrb[46].mxu1  ;;  %v787_v17 = vmul.f32 1.442695, %v716_v10  ;;  %v566_v18 = vadd.f32 %v1991_v57, %v565_v13 }
 0x14a   : > { %v1577_v15 = vpop.eup %1576  ;;  %v884_v16 = vadd.f32 1.0, %v1575_v11  ;;  %1596 = vpow2.f32 %v785_v1  ;;  %v1305_v19 = vpop.f32.mrb[47].mxu0  ;;  %v691_v23 = vadd.f32 %v1991_v57, %v690_v14  ;;  %v837_v25 = vmul.f32 1.442695, %v741_v12 }
 0x14b   : > { %v1380_v20 = vpop.f32.mrb[47].mxu1  ;;  %v1579_v21 = vpop.eup %1578  ;;  %v860_v22 = vadd.f32 1.0, %v1577_v15  ;;  %1598 = vpow2.f32 %v835_v7  ;;  %v717_v26 = vsub.f32 0.0, %v566_v18 }
 0x14c   : > { %v1581_v24 = vpop.eup %1580  ;;  %1028 = vst [vmem:[%s2015_s20 + $0x140] sm:$0xff] %v1579_v21  ;;  %1600 = vrcp.f32 %v884_v16  ;;  %v742_v29 = vsub.f32 0.0, %v691_v23  ;;  %v570_v30 = vpop.f32.mrb[48].mxu0 }
 0x14d   : > { %v1583_v27 = vpop.eup %1582  ;;  %1602 = vrcp.f32 %v860_v22  ;;  %v885_v28 = vadd.f32 1.0, %v1581_v24  ;;  %v789_v32 = vmul.f32 1.442695, %v717_v26  ;;  %v571_v33 = vadd.f32 %v1991_v57, %v570_v30  ;;  %v1308_v34 = vpop.f32.mrb[49].mxu0 }
 0x14e   : > { %v1585_v31 = vpop.eup %1584  ;;  %1004 = vst [vmem:[%s2015_s20 + $0x80] sm:$0xff] %v1583_v27  ;;  %1604 = vpow2.f32 %v787_v17  ;;  %v839_v36 = vmul.f32 1.442695, %v742_v29 }
 0x14f   : > { %v1587_v35 = vpop.eup %1586  ;;  %1029 = vst [vmem:[%s2015_s20 + $0x148] sm:$0xff] %v1585_v31  ;;  %1606 = vrcp.f32 %v885_v28  ;;  %v718_v38 = vsub.f32 0.0, %v571_v33 }
 0x150   : > { %v1589_v37 = vpop.eup %1588  ;;  %1005 = vst [vmem:[%s2015_s20 + $0x88] sm:$0xff] %v1587_v35  ;;  %1608 = vpow2.f32 %v837_v25 }
 0x151   : > { %v1591_v39 = vpop.eup %1590  ;;  %v861_v40 = vadd.f32 1.0, %v1589_v37  ;;  %1610 = vpow2.f32 %v789_v32  ;;  %v791_v43 = vmul.f32 1.442695, %v718_v38 }
 0x152   : > { %v1593_v41 = vpop.eup %1592  ;;  %v886_v42 = vadd.f32 1.0, %v1591_v39  ;;  %1612 = vpow2.f32 %v839_v36 }
 0x153   : > { %v1595_v57 = vpop.eup %1594  ;;  %1030 = vst [vmem:[%s2015_s20 + $0x150] sm:$0xff] %v1593_v41  ;;  %1614 = vrcp.f32 %v861_v40 }
 0x154   : > { %v1597_v44 = vpop.eup %1596  ;;  %1006 = vst [vmem:[%s2015_s20 + $0x90] sm:$0xff] %v1595_v57  ;;  %1616 = vrcp.f32 %v886_v42 }
 0x155   : > { %v1599_v45 = vpop.eup %1598  ;;  %v862_v46 = vadd.f32 1.0, %v1597_v44  ;;  %1618 = vpow2.f32 %v791_v43 }
 0x156   : > { %v1601_v47 = vpop.eup %1600  ;;  %v887_v48 = vadd.f32 1.0, %v1599_v45 }
 0x157   : > { %v1603_v49 = vpop.eup %1602  ;;  %1031 = vst [vmem:[%s2015_s20 + $0x158] sm:$0xff] %v1601_v47  ;;  %1620 = vrcp.f32 %v862_v46 }
 0x158   : > { %v1605_v50 = vpop.eup %1604  ;;  %1007 = vst [vmem:[%s2015_s20 + $0x98] sm:$0xff] %v1603_v49  ;;  %1622 = vrcp.f32 %v887_v48 }
 0x159   : > { %v1607_v51 = vpop.eup %1606  ;;  %v863_v52 = vadd.f32 1.0, %v1605_v50 }
 0x15a   : > { %v1609_v53 = vpop.eup %1608  ;;  %1032 = vst [vmem:[%s2015_s20 + $0x160] sm:$0xff] %v1607_v51 }
 0x15b   : > { %v1611_v54 = vpop.eup %1610  ;;  %1624 = vrcp.f32 %v863_v52  ;;  %v888_v55 = vadd.f32 1.0, %v1609_v53 }
 0x15c   : > { %v1613_v56 = vpop.eup %1612  ;;  %v864_v58 = vadd.f32 1.0, %v1611_v54 }
 0x15d   : > { %v1615_v59 = vpop.eup %1614  ;;  %1626 = vrcp.f32 %v888_v55  ;;  %v889_v60 = vadd.f32 1.0, %v1613_v56 }
 0x15e   : > { %v1617_v61 = vpop.eup %1616  ;;  %1008 = vst [vmem:[%s2015_s20 + $0xa0] sm:$0xff] %v1615_v59  ;;  %1628 = vrcp.f32 %v864_v58 }
 0x15f   : > { %v1619_v62 = vpop.eup %1618  ;;  %1033 = vst [vmem:[%s2015_s20 + $0x168] sm:$0xff] %v1617_v61  ;;  %1630 = vrcp.f32 %v889_v60 }
 0x160   : > { %v865_v63 = vadd.f32 1.0, %v1619_v62 }
 0x161   : > { %v1621_v0 = vpop.eup %1620 }
 0x162   : > { %v1623_v1 = vpop.eup %1622  ;;  %1009 = vst [vmem:[%s2015_s20 + $0xa8] sm:$0xff] %v1621_v0  ;;  %1632 = vrcp.f32 %v865_v63 }
 0x163   : > { %1034 = vst [vmem:[%s2015_s20 + $0x170] sm:$0xff] %v1623_v1 }
 0x165   : > { %v1625_v2 = vpop.eup %1624 }
 0x166   : > { %1010 = vst [vmem:[%s2015_s20 + $0xb0] sm:$0xff] %v1625_v2 }
 0x167   : > { %v1627_v3 = vpop.eup %1626 }
 0x168   : > { %v1629_v4 = vpop.eup %1628  ;;  %1035 = vst [vmem:[%s2015_s20 + $0x178] sm:$0xff] %v1627_v3 }
 0x169   : > { %v1631_v5 = vpop.eup %1630  ;;  %1011 = vst [vmem:[%s2015_s20 + $0xb8] sm:$0xff] %v1629_v4 }
 0x16a   : > { %1036 = vst [vmem:[%s2015_s20 + $0x180] sm:$0xff] %v1631_v5 }
 0x16c   : > { %v1633_v6 = vpop.eup %1632 }
 0x16d   : > { %1012 = vst [vmem:[%s2015_s20 + $0xc0] sm:$0xff] %v1633_v6 }
 0x16e   : > { %1647 = shalt.err (!%p1644_p3)
}
 0x16f   : > { %s1648_s6 = scalar_lea.hbm %s2103_s28, 6272  ;;  %s1652_s9 = scalar_lea.hbm %s2154_s3, 25088 }
 0x170   : > { %p1649_p4 = scmp.ne.s32.totalorder %s2103_s28, %s1648_s6  ;;  %p1653_p9 = scmp.lt.u32.totalorder %s2103_s28, %s2154_s3 }
 0x171   : > { %p1654_p10 = scmp.lt.u32.totalorder %s1652_s9, %s1648_s6  ;;  %p1656_p12 = scmp.lt.u32.totalorder %s1648_s6, %s2103_s28 }
 0x172   : > { %p1650_p7 = pnand %p1649_p4, %p1763_p5 }
 0x173   : > { %p1655_p11 = por %p1654_p10, %p1653_p9 }
 0x174   : > { %p1651_p8 = pneg %p1650_p7 }
 0x175   : > { %p1657_p13 = por %p1656_p12, %p1655_p11 }
 0x177   : > { %p1658_p0 = pnand %p1657_p13, %p1651_p8 }
 0x179   : > { %1661 = shalt.err (!%p1658_p0)
}
 0x17a   : > { %s1703_s17 = smov 128   ;;  %s1704_s19 = smov 8  }
 0x17b   : > { %1393 = dma.vmem_to_hbm [thread:$0]  (%p1763_p5), %s2105_s25, 6272, %s2103_s28, %s2110_s16, %s1703_s17, %s1703_s17, %s1704_s19  }
 0x17c PF: > { %p1399_p1 = scmp.ge.s32.totalorder %s1696_s15, 2  ;;  %s1066_s20 = sand.u32 1, %s1684_s12  }
 0x17d   : > { %s1067_s24 = scalar_lea.sflag [#allocation3], %s1066_s20 }
 0x17e   : > { %p1396_p2 = pnand %p1399_p1, %p1767_p6 }
 0x180   : > { %1679 = dma.done.wait (!%p1396_p2), %s1067_s24, 6272  }
 0x181   : > { %1681 = vsyncadd (!%p1396_p2), %s1067_s24, 4294961024  ;;  %p13_p3 = scmp.ge.s32.totalorder %s1750_s18, 6   ;;  %s2157_s12 = smov %s1688_s13 }
 0x182   : > { %s2158_s13 = smov %s1692_s14  ;;  %s2159_s14 = smov %s1761_s21 }
 0x183   : > { %s2160_s15 = smov %s1750_s18  ;;  %15 = sbr.rel (!%p13_p3) target bundleno = 3 (0x3), region = 67 }
 0x18a   :  { %1072 = vsyncpa [#allocation3], 1 }
 0x18b   :  { %1074 = vsyncpa [#allocation3 + $0x1], 1 }

</bundles_post_ra>
